<compile_context>
chip_gen: v7x
topology: tpu7x:2x2x1
jax: 0.10.0
libtpu: 0.0.40
codegen_flags: <defaults>
</compile_context>

<pallas_src>
import functools

import numpy as np
import jax
import jax.numpy as jnp
from jax.experimental import pallas as pl
from jax.experimental.pallas import tpu as pltpu

N_BINS = 30
# torch.linspace(0, 1, n_bins + 1) is float32.
_BIN_BOUNDARIES = np.linspace(0.0, 1.0, N_BINS + 1, dtype=np.float32)


def _ece_kernel(n_total, lo_ref, hi_ref, logits_ref, labels_ref, out_ref, bin_acc_ref):
    step = pl.program_id(0)

    @pl.when(step == 0)
    def _():
        bin_acc_ref[...] = jnp.zeros_like(bin_acc_ref)

    logits = logits_ref[...]                              # (TILE_N, C), input dtype
    labels = labels_ref[...]                              # (TILE_N, 1) int32
    tn, C = logits.shape

    # confidences, predictions = torch.max(logits, 1)
    row_max = jnp.max(logits, axis=1, keepdims=True)      # (TILE_N, 1), input dtype
    conf = row_max.astype(jnp.float32)                    # upcast only the column

    col = jax.lax.broadcasted_iota(jnp.int32, (tn, C), 1)
    is_max = logits == row_max
    # first index achieving the maximum (matches torch tie-breaking)
    pred = jnp.min(jnp.where(is_max, col, C), axis=1, keepdims=True)  # (TILE_N, 1)

    # accuracies = predictions.eq(labels)
    acc = (pred == labels).astype(jnp.float32)             # (TILE_N, 1)
    diff = conf - acc                                      # (TILE_N, 1)

    # Fused bin loop: one broadcast compare over all 30 bins at once.
    lo = lo_ref[...]                                       # (1, N_BINS)
    hi = hi_ref[...]                                       # (1, N_BINS)
    in_bin = (conf > lo) & (conf <= hi)                    # (TILE_N, N_BINS)
    contrib = jnp.where(in_bin, diff, jnp.float32(0.0))    # (TILE_N, N_BINS)

    # Per-bin signed partial sums (carry across grid steps; abs only at the end).
    bin_acc_ref[...] += jnp.sum(contrib, axis=0, keepdims=True)   # (1, N_BINS)

    @pl.when(step == pl.num_programs(0) - 1)
    def _():
        out_ref[0] = jnp.sum(jnp.abs(bin_acc_ref[...])) / jnp.float32(n_total)


def ece_loss(logits, labels, *, tile_n=512, vmem_limit_bytes=48 * 1024 * 1024):
    """logits: (N, C) float, labels: (N,) int -> (1,) float32 ECE (matches torch output shape).

    tile_n: rows per grid step.  Pick the largest tile that fits VMEM
    (double-buffered logits ~ 2 * tile_n * C * itemsize); on v7x (64 MiB VMEM)
    use roughly half the tile you'd pick for v5e/v6e (128 MiB) when C is large.
    """
    N, C = logits.shape
    labels2 = labels.reshape(N, 1).astype(jnp.int32)

    # Sublane-aligned tile, clipped to (padded) N.
    tile_n = max(8, (min(int(tile_n), N + 7) // 8) * 8)
    num_tiles = -(-N // tile_n)             # cdiv
    n_pad = num_tiles * tile_n
    if n_pad != N:
        pad = n_pad - N
        # Filler confidence 2.0 lies outside every bin (0, 1] -> contributes 0.
        logits = jnp.concatenate(
            [logits, jnp.full((pad, C), 2.0, dtype=logits.dtype)], axis=0)
        labels2 = jnp.concatenate(
            [labels2, jnp.full((pad, 1), -1, dtype=jnp.int32)], axis=0)

    lo_row = jnp.asarray(_BIN_BOUNDARIES[:-1]).reshape(1, N_BINS)
    hi_row = jnp.asarray(_BIN_BOUNDARIES[1:]).reshape(1, N_BINS)

    bytes_accessed = (n_pad * C * logits.dtype.itemsize     # logits stream
                      + n_pad * 4                           # labels
                      + 2 * N_BINS * 4 + 4)                 # boundaries + scalar out
    cost = pl.CostEstimate(
        flops=3 * n_pad * C + 3 * n_pad * N_BINS,
        transcendentals=0,
        bytes_accessed=bytes_accessed,
    )

    kernel = functools.partial(_ece_kernel, N)
    return pl.pallas_call(
        kernel,
        out_shape=jax.ShapeDtypeStruct((1,), jnp.float32),
        grid_spec=pltpu.PrefetchScalarGridSpec(
            num_scalar_prefetch=0,
            grid=(num_tiles,),
            in_specs=[
                pl.BlockSpec((1, N_BINS), lambda i: (0, 0)),       # bin lowers
                pl.BlockSpec((1, N_BINS), lambda i: (0, 0)),       # bin uppers
                pl.BlockSpec((tile_n, C), lambda i: (i, 0)),       # logits tile
                pl.BlockSpec((tile_n, 1), lambda i: (i, 0)),       # labels tile
            ],
            out_specs=pl.BlockSpec(memory_space=pltpu.SMEM),       # scalar ece
            scratch_shapes=[pltpu.VMEM((1, N_BINS), jnp.float32)], # per-bin carry
        ),
        compiler_params=pltpu.CompilerParams(
            dimension_semantics=("arbitrary",),                    # accumulator carry
            vmem_limit_bytes=vmem_limit_bytes,
        ),
        cost_estimate=cost,
    )(lo_row, hi_row, logits, labels2)


def ece_reference(logits, labels):
    """Plain-JAX reference mirroring the PyTorch forward."""
    conf = jnp.max(logits, axis=1)
    pred = jnp.argmax(logits, axis=1)
    acc = (pred == labels).astype(jnp.float32)
    ece = 0.0
    N = logits.shape[0]
    for b in range(N_BINS):
        lo = float(_BIN_BOUNDARIES[b])
        hi = float(_BIN_BOUNDARIES[b + 1])
        in_bin = (conf > lo) & (conf <= hi)
        s = jnp.sum(jnp.where(in_bin, conf - acc, 0.0))
        ece = ece + jnp.abs(s)
    return jnp.asarray([ece / N], dtype=jnp.float32)


if __name__ == "__main__":
    key = jax.random.PRNGKey(0)
    k1, k2 = jax.random.split(key)

    # Case 1: N divisible by the tile (4 grid steps -> exercises accumulation).
    N, C = 256, 16
    logits = jax.random.uniform(k1, (N, C), dtype=jnp.float32)
    labels = jax.random.randint(k2, (N,), 0, C, dtype=jnp.int32)

    ece = ece_loss(logits, labels, tile_n=64)
    jax.block_until_ready(ece)
    ref = ece_reference(logits, labels)
    np.testing.assert_allclose(np.asarray(ece), np.asarray(ref), rtol=1e-5, atol=1e-6)

    # Case 2: ragged N (exercises the padding path).
    N2 = 200
    logits2 = logits[:N2]
    labels2 = labels[:N2]
    ece2 = ece_loss(logits2, labels2, tile_n=64)
    jax.block_until_ready(ece2)
    ref2 = ece_reference(logits2, labels2)
    np.testing.assert_allclose(np.asarray(ece2), np.asarray(ref2), rtol=1e-5, atol=1e-6)

    print("KERNEL_OK")
</pallas_src>

<mosaic_0001>
module attributes {stable_mosaic.version = 11 : i64} {
  func.func @_ece_kernel(%arg0: i32, %arg1: memref<1x30xf32, #tpu.memory_space<vmem>>, %arg2: memref<1x30xf32, #tpu.memory_space<vmem>>, %arg3: memref<64x16xf32, #tpu.memory_space<vmem>>, %arg4: memref<64x1xi32, #tpu.memory_space<vmem>>, %arg5: memref<1xf32, #tpu.memory_space<smem>>, %arg6: memref<1x30xf32, #tpu.memory_space<vmem>>) attributes {dimension_semantics = [#tpu.dimension_semantics<arbitrary>], iteration_bounds = array<i64: 4>, scalar_prefetch = 0 : i64, scratch_operands = 1 : i64, tpu.core_type = #tpu.core_type<tc>, window_params = [{pipeline_mode = #tpu.pipeline_mode<synchronous>, transform_indices = @transform_0, window_bounds = array<i64: 1, 30>}, {pipeline_mode = #tpu.pipeline_mode<synchronous>, transform_indices = @transform_1, window_bounds = array<i64: 1, 30>}, {transform_indices = @transform_2, window_bounds = array<i64: 64, 16>}, {transform_indices = @transform_3, window_bounds = array<i64: 64, 1>}, {transform_indices = @transform_4, window_bounds = array<i64: 1>}]} {
    %c0_i32 = arith.constant 0 : i32
    %0 = arith.cmpi eq, %arg0, %c0_i32 : i32
    %1 = arith.extui %0 : i1 to i32
    %c0_i32_0 = arith.constant 0 : i32
    %2 = arith.cmpi ne, %1, %c0_i32_0 : i32
    scf.if %2 {
      %cst_16 = arith.constant 0.000000e+00 : f32
      %39 = vector.broadcast %cst_16 : f32 to vector<1x30xf32>
      %c0_17 = arith.constant 0 : index
      %c0_18 = arith.constant 0 : index
      %40 = vector.load %arg6[%c0_17, %c0_18] : memref<1x30xf32, #tpu.memory_space<vmem>>, vector<1x30xf32>
      tpu.vector_store %arg6[%c0_17, %c0_18], %39 {strides = array<i32>} : memref<1x30xf32, #tpu.memory_space<vmem>>, vector<1x30xf32>,
    } else {
    }
    %c0 = arith.constant 0 : index
    %c0_1 = arith.constant 0 : index
    %3 = vector.load %arg3[%c0, %c0_1] : memref<64x16xf32, #tpu.memory_space<vmem>>, vector<64x16xf32>
    %c0_2 = arith.constant 0 : index
    %c0_3 = arith.constant 0 : index
    %4 = vector.load %arg4[%c0_2, %c0_3] : memref<64x1xi32, #tpu.memory_space<vmem>>, vector<64x1xi32>
    %cst = arith.constant dense<0xFF800000> : vector<64xf32>
    %5 = vector.multi_reduction <maximumf>, %3, %cst [1] : vector<64x16xf32> to vector<64xf32>
    %6 = vector.shape_cast %5 : vector<64xf32> to vector<64x1xf32>
    %7 = tpu.iota {dimensions = array<i32: 1>} : vector<64x16xi32>
    %8 = vector.broadcast %6 : vector<64x1xf32> to vector<64x16xf32>
    %9 = arith.cmpf oeq, %3, %8 : vector<64x16xf32>
    %c16_i32 = arith.constant 16 : i32
    %10 = vector.broadcast %c16_i32 : i32 to vector<64x16xi32>
    %11 = arith.select %9, %7, %10 : vector<64x16xi1>, vector<64x16xi32>
    %cst_4 = arith.constant dense<2147483647> : vector<64xi32>
    %12 = vector.multi_reduction <minsi>, %11, %cst_4 [1] : vector<64x16xi32> to vector<64xi32>
    %13 = vector.shape_cast %12 : vector<64xi32> to vector<64x1xi32>
    %14 = arith.cmpi eq, %13, %4 : vector<64x1xi32>
    %15 = arith.extui %14 : vector<64x1xi1> to vector<64x1xi32>
    %16 = arith.sitofp %15 : vector<64x1xi32> to vector<64x1xf32>
    %17 = arith.subf %6, %16 : vector<64x1xf32>
    %c0_5 = arith.constant 0 : index
    %c0_6 = arith.constant 0 : index
    %18 = vector.load %arg1[%c0_5, %c0_6] : memref<1x30xf32, #tpu.memory_space<vmem>>, vector<1x30xf32>
    %c0_7 = arith.constant 0 : index
    %c0_8 = arith.constant 0 : index
    %19 = vector.load %arg2[%c0_7, %c0_8] : memref<1x30xf32, #tpu.memory_space<vmem>>, vector<1x30xf32>
    %20 = vector.broadcast %6 : vector<64x1xf32> to vector<64x30xf32>
    %21 = vector.broadcast %18 : vector<1x30xf32> to vector<64x30xf32>
    %22 = arith.cmpf ogt, %20, %21 : vector<64x30xf32>
    %23 = vector.broadcast %6 : vector<64x1xf32> to vector<64x30xf32>
    %24 = vector.broadcast %19 : vector<1x30xf32> to vector<64x30xf32>
    %25 = arith.cmpf ole, %23, %24 : vector<64x30xf32>
    %26 = arith.andi %22, %25 : vector<64x30xi1>
    %cst_9 = arith.constant 0.000000e+00 : f32
    %27 = vector.shape_cast %17 : vector<64x1xf32> to vector<64x1xf32>
    %28 = vector.broadcast %27 : vector<64x1xf32> to vector<64x30xf32>
    %29 = vector.broadcast %cst_9 : f32 to vector<64x30xf32>
    %30 = arith.select %26, %28, %29 : vector<64x30xi1>, vector<64x30xf32>
    %c0_10 = arith.constant 0 : index
    %c0_11 = arith.constant 0 : index
    %31 = vector.load %arg6[%c0_10, %c0_11] : memref<1x30xf32, #tpu.memory_space<vmem>>, vector<1x30xf32>
    %cst_12 = arith.constant dense<0.000000e+00> : vector<30xf32>
    %32 = vector.multi_reduction <add>, %30, %cst_12 [0] : vector<64x30xf32> to vector<30xf32>
    %33 = vector.shape_cast %32 : vector<30xf32> to vector<1x30xf32>
    %34 = arith.addf %31, %33 : vector<1x30xf32>
    %c0_13 = arith.constant 0 : index
    %c0_14 = arith.constant 0 : index
    %35 = vector.load %arg6[%c0_13, %c0_14] : memref<1x30xf32, #tpu.memory_space<vmem>>, vector<1x30xf32>
    tpu.vector_store %arg6[%c0_13, %c0_14], %34 {strides = array<i32>} : memref<1x30xf32, #tpu.memory_space<vmem>>, vector<1x30xf32>,
    %c3_i32 = arith.constant 3 : i32
    %36 = arith.cmpi eq, %arg0, %c3_i32 : i32
    %37 = arith.extui %36 : i1 to i32
    %c0_i32_15 = arith.constant 0 : i32
    %38 = arith.cmpi ne, %37, %c0_i32_15 : i32
    scf.if %38 {
      %c0_16 = arith.constant 0 : index
      %c0_17 = arith.constant 0 : index
      %39 = vector.load %arg6[%c0_16, %c0_17] : memref<1x30xf32, #tpu.memory_space<vmem>>, vector<1x30xf32>
      %40 = math.absf %39 : vector<1x30xf32>
      %41 = vector.shape_cast %40 : vector<1x30xf32> to vector<1x1x30xf32>
      %cst_18 = arith.constant dense<0.000000e+00> : vector<1xf32>
      %42 = vector.multi_reduction <add>, %41, %cst_18 [1, 2] : vector<1x1x30xf32> to vector<1xf32>
      %43 = vector.shape_cast %42 : vector<1xf32> to vector<1x1x1xf32>
      %44 = vector.extract %43[0, 0, 0] : f32 from vector<1x1x1xf32>
      %cst_19 = arith.constant 2.560000e+02 : f32
      %45 = arith.divf %44, %cst_19 : f32
      %c0_20 = arith.constant 0 : index
      %46 = memref.load %arg5[%c0_20] : memref<1xf32, #tpu.memory_space<smem>>
      memref.store %45, %arg5[%c0_20] : memref<1xf32, #tpu.memory_space<smem>>
    } else {
    }
    return
  }
  func.func @transform_0(%arg0: i32) -> (i32, i32) {
    %c0_i32 = arith.constant 0 : i32
    %c0_i32_0 = arith.constant 0 : i32
    %c0_i32_1 = arith.constant 0 : i32
    return %c0_i32, %c0_i32_0 : i32, i32
  }
  func.func @transform_1(%arg0: i32) -> (i32, i32) {
    %c0_i32 = arith.constant 0 : i32
    %c0_i32_0 = arith.constant 0 : i32
    %c0_i32_1 = arith.constant 0 : i32
    return %c0_i32, %c0_i32_0 : i32, i32
  }
  func.func @transform_2(%arg0: i32) -> (i32, i32) {
    %c0_i32 = arith.constant 0 : i32
    %c0_i32_0 = arith.constant 0 : i32
    return %arg0, %c0_i32 : i32, i32
  }
  func.func @transform_3(%arg0: i32) -> (i32, i32) {
    %c0_i32 = arith.constant 0 : i32
    %c0_i32_0 = arith.constant 0 : i32
    return %arg0, %c0_i32 : i32, i32
  }
  func.func @transform_4(%arg0: i32) -> i32 {
    %c0_i32 = arith.constant 0 : i32
    %c0_i32_0 = arith.constant 0 : i32
    return %c0_i32 : i32
  }
}

</mosaic_0001>

<bundles_post_ra>
// kernel: tpu_custom_call.1
= control target key start
LH: loop header
LB: loop body
LE: loop exit
PB: predicated region body
PF: predicated region fallthrough
CT: control target
= control target key end

     0   :  { %9 = vsyncpa [#allocation4], 0  ;;  %s714_s15 = smov 0   ;;  %s859_s0 = inlined_call_operand.vmem [shape: f32[1,30], index: 0, kind: input, shape index: {}]   ;;  %s860_s1 = inlined_call_operand.vmem [shape: f32[1,30], index: 1, kind: input, shape index: {}]   ;;  %s861_s2 = inlined_call_operand.vmem [shape: f32[256,16], index: 2, kind: input, shape index: {}]   ;;  %s862_s3 = inlined_call_operand.vmem [shape: s32[256,1], index: 3, kind: input, shape index: {}]   ;;  %s863_s4 = inlined_call_operand.hbm [shape: f32[1], index: 4, kind: output, shape index: {}]  }
   0x1 LB: > { %s720_s16 = sadd.s32 4294967295, %s683_s15   ;;  %p618_p0 = scmp.ge.s32.totalorder %s683_s15, 1  ;;  %s683_s15 = sphi %s714_s15, %s15_s15  }
   0x2   : > { %p170_p1 = scmp.lt.s32.totalorder %s683_s15, 5 }
   0x4   : > { %p171_p2 = pnand %p618_p0, %p170_p1 }
   0x5   : > { %s619_s17 = sshll.u32 (!%p171_p2), %s720_s16, 3  ;;  %p623_p4 = scmp.ne.s32.totalorder (!%p171_p2), %s720_s16, 0 }
   0x6   : > { %174 = sbr.rel (%p171_p2) target bundleno = 872 (0x368), region = 36  ;;  %p197_p3 = scmp.lt.s32.totalorder (!%p171_p2), %s619_s17, 31 }
   0xd   : > { %s867_s17 = smov (!%p197_p3, %s619_s17), 31  ;;  %211 = sbr.rel (%p623_p4) target bundleno = 20 (0x14), region = 40 }
   0xe   : > { %s620_s18 = sshll.u32 %s867_s17, 3  ;;  %vm212_vm0 = vcmask (!%p623_p4), 237568   ;;  %v685_v0 = vmov (!%p623_p4), 0.0  }
   0xf   : > { %s200_s21 = scalar_lea.vmem %s861_s2, %s620_s18  ;;  %s731_s24 = scalar_lea.vmem %s862_s3, %s620_s18  ;;  %213 = vst.msk [vmem:[#allocation2] sm:$0x1] (!%p623_p4), %vm212_vm0, %v685_v0 }
  0x14 PF: > { %v214_v1 = vld [vmem:[%s200_s21] sm:$0xff]  ;;  %vm230_vm1 = vcmask 130048   ;;  %v216_v2 = vld [vmem:[%s200_s21 + $0x10] sm:$0xff]  ;;  %v215_v3 = vld [vmem:[%s200_s21 + $0x8] sm:$0xff]  ;;  %v255_v17 = vlaneseq  ;;  %p634_p5 = scmp.ne.s32.totalorder %s720_s16, 3 }
  0x15   : > { %v231_v4 = vsel %vm230_vm1, %v214_v1, -inf  ;;  %v237_v5 = vsel %vm230_vm1, %v216_v2, -inf  ;;  %v217_v6 = vld [vmem:[%s200_s21 + $0x18] sm:$0xff]  ;;  %v234_v7 = vsel %vm230_vm1, %v215_v3, -inf  ;;  %v218_v9 = vld [vmem:[%s200_s21 + $0x20] sm:$0xff]  ;;  %v219_v10 = vld [vmem:[%s200_s21 + $0x28] sm:$0xff] }
  0x16   : > { %232 = vmax.xlane.f32.xlu0 %v231_v4  ;;  %238 = vmax.xlane.f32.xlu1 %v237_v5  ;;  %v240_v8 = vsel %vm230_vm1, %v217_v6, -inf  ;;  %v243_v11 = vsel %vm230_vm1, %v218_v9, -inf  ;;  %v246_v12 = vsel %vm230_vm1, %v219_v10, -inf  ;;  %v220_v13 = vld [vmem:[%s200_s21 + $0x30] sm:$0xff]  ;;  %v221_v14 = vld [vmem:[%s200_s21 + $0x38] sm:$0xff]  ;;  %v256_v18 = vand.u32 127, %v255_v17 }
  0x17   : > { %v249_v15 = vsel %vm230_vm1, %v220_v13, -inf  ;;  %v252_v16 = vsel %vm230_vm1, %v221_v14, -inf }
  0x1a   : > { %235 = vmax.xlane.f32.xlu0 %v234_v7  ;;  %241 = vmax.xlane.f32.xlu1 %v240_v8 }
  0x1e   : > { %244 = vmax.xlane.f32.xlu0 %v243_v11  ;;  %247 = vmax.xlane.f32.xlu1 %v246_v12 }
  0x22   : > { %250 = vmax.xlane.f32.xlu0 %v249_v15  ;;  %253 = vmax.xlane.f32.xlu1 %v252_v16 }
  0xa3   : > { %v742_v19 = vpop.xlane.xlu0 %232  ;;  %v744_v20 = vpop.xlane.xlu1 %238 }
  0xa4   : > { %vm257_vm2 = vcmp.eq.f32.partialorder %v214_v1, %v742_v19  ;;  %vm259_vm3 = vcmp.eq.f32.partialorder %v216_v2, %v744_v20 }
  0xa5   : > { %v265_v21 = vsel %vm257_vm2, %v256_v18, 16  ;;  %v267_v22 = vsel %vm259_vm3, %v256_v18, 16 }
  0xa6   : > { %v273_v23 = vsel %vm230_vm1, %v265_v21, 2147483647  ;;  %v303_v24 = vsel %vm230_vm1, %v267_v22, 2147483647 }
  0xa7   : > { %v750_v25 = vpop.xlane.xlu0 %235  ;;  %v752_v26 = vpop.xlane.xlu1 %241  ;;  %v275_v27 = vshra.s32 %v273_v23, 16  ;;  %v305_v28 = vshra.s32 %v303_v24, 16  ;;  %v274_v59 = vand.u32 65535, %v273_v23  ;;  %v304_v63 = vand.u32 65535, %v303_v24 }
  0xa8   : > { %vm258_vm4 = vcmp.eq.f32.partialorder %v215_v3, %v750_v25  ;;  %vm260_vm5 = vcmp.eq.f32.partialorder %v217_v6, %v752_v26 }
  0xa9   : > { %v277_v29 = vcvt.s32.f32 %v275_v27  ;;  %v266_v30 = vsel %vm258_vm4, %v256_v18, 16  ;;  %v268_v31 = vsel %vm260_vm5, %v256_v18, 16  ;;  %v307_v36 = vcvt.s32.f32 %v305_v28 }
  0xaa   : > { %v288_v32 = vsel %vm230_vm1, %v266_v30, 2147483647  ;;  %v318_v33 = vsel %vm230_vm1, %v268_v31, 2147483647  ;;  %v276_v61 = vcvt.s32.f32 %v274_v59  ;;  %v306_v4 = vcvt.s32.f32 %v304_v63 }
  0xab   : > { %278 = vmin.xlane.f32.xlu0 %v277_v29  ;;  %v758_v34 = vpop.xlane.xlu0 %244  ;;  %v760_v35 = vpop.xlane.xlu1 %247  ;;  %v290_v37 = vshra.s32 %v288_v32, 16  ;;  %v320_v38 = vshra.s32 %v318_v33, 16  ;;  %v289_v62 = vand.u32 65535, %v288_v32  ;;  %v319_v5 = vand.u32 65535, %v318_v33 }
  0xac   : > { %vm261_vm6 = vcmp.eq.f32.partialorder %v218_v9, %v758_v34  ;;  %vm262_vm7 = vcmp.eq.f32.partialorder %v219_v10, %v760_v35  ;;  %v686_v31 = vmov 0  }
  0xad   : > { %v292_v39 = vcvt.s32.f32 %v290_v37  ;;  %v269_v40 = vsel %vm261_vm6, %v256_v18, 16  ;;  %v270_v41 = vsel %vm262_vm7, %v256_v18, 16  ;;  %v322_v46 = vcvt.s32.f32 %v320_v38  ;;  %659 = vset.pattern.permute.xlu0 %v686_v31  ;;  %660 = vset.pattern.permute.xlu1 %v686_v31  ;;  %v228_v31 = vld [vmem:[%s731_s24 + $0x30] sm:$0xff] }
  0xae   : > { %v333_v42 = vsel %vm230_vm1, %v269_v40, 2147483647  ;;  %v348_v43 = vsel %vm230_vm1, %v270_v41, 2147483647  ;;  %v291_v3 = vcvt.s32.f32 %v289_v62  ;;  %v321_v11 = vcvt.s32.f32 %v319_v5  ;;  %v222_v40 = vld [vmem:[%s731_s24] sm:$0xff] }
  0xaf   : > { %308 = vmin.xlane.f32.xlu0 %v307_v36  ;;  %293 = vmin.xlane.f32.xlu1 %v292_v39  ;;  %v766_v44 = vpop.xlane.xlu0 %250  ;;  %v768_v45 = vpop.xlane.xlu1 %253  ;;  %v335_v47 = vshra.s32 %v333_v42, 16  ;;  %v350_v48 = vshra.s32 %v348_v43, 16  ;;  %v334_v6 = vand.u32 65535, %v333_v42 }
  0xb0   : > { %vm263_vm8 = vcmp.eq.f32.partialorder %v220_v13, %v766_v44  ;;  %vm264_vm9 = vcmp.eq.f32.partialorder %v221_v14, %v768_v45  ;;  %v349_v13 = vand.u32 65535, %v348_v43 }
  0xb1   : > { %v337_v49 = vcvt.s32.f32 %v335_v47  ;;  %v271_v50 = vsel %vm263_vm8, %v256_v18, 16  ;;  %v272_v51 = vsel %vm264_vm9, %v256_v18, 16  ;;  %v352_v54 = vcvt.s32.f32 %v350_v48 }
  0xb2   : > { %v363_v52 = vsel %vm230_vm1, %v271_v50, 2147483647  ;;  %v378_v53 = vsel %vm230_vm1, %v272_v51, 2147483647  ;;  %v336_v12 = vcvt.s32.f32 %v334_v6  ;;  %v351_v21 = vcvt.s32.f32 %v349_v13  ;;  %v223_v51 = vld [vmem:[%s731_s24 + $0x8] sm:$0xff] }
  0xb3   : > { %323 = vmin.xlane.f32.xlu1 %v322_v46  ;;  %338 = vmin.xlane.f32.xlu0 %v337_v49  ;;  %v365_v55 = vshra.s32 %v363_v52, 16  ;;  %v380_v56 = vshra.s32 %v378_v53, 16  ;;  %v364_v14 = vand.u32 65535, %v363_v52  ;;  %v379_v23 = vand.u32 65535, %v378_v53  ;;  %v224_v52 = vld [vmem:[%s731_s24 + $0x10] sm:$0xff] }
  0xb4   : > { %v687_v53 = vmov 0.0  }
  0xb5   : > { %v367_v57 = vcvt.s32.f32 %v365_v55  ;;  %v382_v58 = vcvt.s32.f32 %v380_v56  ;;  %v366_v22 = vcvt.s32.f32 %v364_v14 }
  0xb7   : > { %353 = vmin.xlane.f32.xlu1 %v352_v54  ;;  %368 = vmin.xlane.f32.xlu0 %v367_v57 }
  0xbb   : > { %383 = vmin.xlane.f32.xlu1 %v382_v58 }
 0x138   : > { %v279_v60 = vpop.xlane.xlu0 %278 }
 0x139   : > { %vm280_vm10 = vcmp.eq.f32.partialorder %v277_v29, %v279_v60  ;;  %v381_v29 = vcvt.s32.f32 %v379_v23  ;;  %v285_v32 = vcvt.f32.s32 %v279_v60 }
 0x13a   : > { %v281_v0 = vsel %vm280_vm10, %v276_v61, inf }
 0x13b   : > { %282 = vmin.xlane.f32.xlu0 %v281_v0  ;;  %v286_v37 = vshll.u32 %v285_v32, 16  ;;  %v225_v0 = vld [vmem:[%s731_s24 + $0x18] sm:$0xff] }
 0x13c   : > { %v294_v1 = vpop.xlane.xlu1 %293  ;;  %v309_v2 = vpop.xlane.xlu0 %308 }
 0x13d   : > { %vm295_vm11 = vcmp.eq.f32.partialorder %v292_v39, %v294_v1  ;;  %vm310_vm12 = vcmp.eq.f32.partialorder %v307_v36, %v309_v2  ;;  %v300_v33 = vcvt.f32.s32 %v294_v1  ;;  %v315_v38 = vcvt.f32.s32 %v309_v2 }
 0x13e   : > { %v296_v7 = vsel %vm295_vm11, %v291_v3, inf  ;;  %v311_v8 = vsel %vm310_vm12, %v306_v4, inf }
 0x13f   : > { %297 = vmin.xlane.f32.xlu1 %v296_v7  ;;  %312 = vmin.xlane.f32.xlu0 %v311_v8  ;;  %v301_v42 = vshll.u32 %v300_v33, 16  ;;  %v316_v48 = vshll.u32 %v315_v38, 16  ;;  %v229_v38 = vld [vmem:[%s731_s24 + $0x38] sm:$0xff] }
 0x140   : > { %v324_v9 = vpop.xlane.xlu1 %323  ;;  %v774_v10 = vpop.xlane.xlu0 %338 }
 0x141   : > { %vm325_vm13 = vcmp.eq.f32.partialorder %v322_v46, %v324_v9  ;;  %vm340_vm14 = vcmp.eq.f32.partialorder %v337_v49, %v774_v10  ;;  %v330_v43 = vcvt.f32.s32 %v324_v9  ;;  %v345_v55 = vcvt.f32.s32 %v774_v10  ;;  %v226_v10 = vld [vmem:[%s731_s24 + $0x20] sm:$0xff] }
 0x142   : > { %v326_v15 = vsel %vm325_vm13, %v321_v11, inf  ;;  %v341_v16 = vsel %vm340_vm14, %v336_v12, inf }
 0x143   : > { %327 = vmin.xlane.f32.xlu1 %v326_v15  ;;  %342 = vmin.xlane.f32.xlu0 %v341_v16  ;;  %v331_v59 = vshll.u32 %v330_v43, 16  ;;  %v346_v2 = vshll.u32 %v345_v55, 16 }
 0x144   : > { %v777_v17 = vpop.xlane.xlu1 %353  ;;  %v779_v18 = vpop.xlane.xlu0 %368 }
 0x145   : > { %vm355_vm15 = vcmp.eq.f32.partialorder %v352_v54, %v777_v17  ;;  %vm370_vm0 = vcmp.eq.f32.partialorder %v367_v57, %v779_v18  ;;  %v360_v3 = vcvt.f32.s32 %v777_v17  ;;  %v375_v13 = vcvt.f32.s32 %v779_v18 }
 0x146   : > { %v356_v24 = vsel %vm355_vm15, %v351_v21, inf  ;;  %v371_v27 = vsel %vm370_vm0, %v366_v22, inf  ;;  %v227_v21 = vld [vmem:[%s731_s24 + $0x28] sm:$0xff] }
 0x147   : > { %357 = vmin.xlane.f32.xlu1 %v356_v24  ;;  %372 = vmin.xlane.f32.xlu0 %v371_v27  ;;  %v361_v12 = vshll.u32 %v360_v3, 16  ;;  %v376_v23 = vshll.u32 %v375_v13, 16  ;;  %v511_v13 = vld [vmem:[#allocation2] sm:$0x1] }
 0x148   : > { %v783_v28 = vpop.xlane.xlu1 %383 }
 0x149   : > { %vm385_vm1 = vcmp.eq.f32.partialorder %v382_v58, %v783_v28  ;;  %v390_v24 = vcvt.f32.s32 %v783_v28 }
 0x14a   : > { %v386_v30 = vsel %vm385_vm1, %v381_v29, inf }
 0x14b   : > { %387 = vmin.xlane.f32.xlu1 %v386_v30  ;;  %v391_v32 = vshll.u32 %v390_v24, 16 }
 0x1c8   : > { %v283_v36 = vpop.xlane.xlu0 %282 }
 0x1c9   : > { %v284_v39 = vcvt.f32.s32 %v283_v36 }
 0x1cb   : > { %v287_v41 = vadd.s32 %v286_v37, %v284_v39 }
 0x1cc   : > { %v298_v46 = vpop.xlane.xlu1 %297  ;;  %v313_v47 = vpop.xlane.xlu0 %312 }
 0x1cd   : > { %vm393_vm2 = vcmp.eq.s32.totalorder %v287_v41, %v222_v40  ;;  %v299_v49 = vcvt.f32.s32 %v298_v46  ;;  %v314_v50 = vcvt.f32.s32 %v313_v47  ;;  %v632_v46 = vld [vmem:[%s859_s0] ss:$0 sm:$0xff] }
 0x1ce   : > { %v624_v54 = vsel %vm393_vm2, 1.0, %v687_v53  ;;  %v633_v47 = vld [vmem:[%s860_s1] ss:$0 sm:$0xff]  ;;  %vm434_vm10 = vcmp.gt.f32.partialorder %v750_v25, %v632_v46  ;;  %vm433_vm12 = vcmp.gt.f32.partialorder %v742_v19, %v632_v46  ;;  %vm435_vm14 = vcmp.gt.f32.partialorder %v744_v20, %v632_v46 }
 0x1cf   : > { %v302_v56 = vadd.s32 %v301_v42, %v299_v49  ;;  %v317_v57 = vadd.s32 %v316_v48, %v314_v50  ;;  %v417_v58 = vsub.f32 %v742_v19, %v624_v54  ;;  %vm448_vm11 = vcmp.le.f32.partialorder %v750_v25, %v633_v47 }
 0x1d0   : > { %v328_v60 = vpop.xlane.xlu1 %327  ;;  %v343_v61 = vpop.xlane.xlu0 %342  ;;  %vm447_vm13 = vcmp.le.f32.partialorder %v742_v19, %v633_v47  ;;  %vm449_vm15 = vcmp.le.f32.partialorder %v744_v20, %v633_v47  ;;  %vm456_vm0 = vmand %vm434_vm10, %vm448_vm11  ;;  %vm436_vm2 = vcmp.gt.f32.partialorder %v752_v26, %v632_v46  ;;  %vm452_vm10 = vcmp.le.f32.partialorder %v760_v35, %v633_v47 }
 0x1d1   : > { %vm394_vm3 = vcmp.eq.s32.totalorder %v302_v56, %v223_v51  ;;  %vm395_vm4 = vcmp.eq.s32.totalorder %v317_v57, %v224_v52  ;;  %v329_v62 = vcvt.f32.s32 %v328_v60  ;;  %v344_v63 = vcvt.f32.s32 %v343_v61  ;;  %465 = vperm.xlu0 %659, %v417_v58   ;;  %vm818_vm1 = vmand %vm433_vm12, %vm447_vm13 }
 0x1d2   : > { %v625_v1 = vsel %vm394_vm3, 1.0, %v687_v53  ;;  %v626_v7 = vsel %vm395_vm4, 1.0, %v687_v53  ;;  %vm450_vm3 = vcmp.le.f32.partialorder %v752_v26, %v633_v47  ;;  %vm457_vm4 = vmand %vm435_vm14, %vm449_vm15  ;;  %vm439_vm13 = vcmp.gt.f32.partialorder %v766_v44, %v632_v46 }
 0x1d3   : > { %v332_v4 = vadd.s32 %v331_v59, %v329_v62  ;;  %v418_v5 = vsub.f32 %v750_v25, %v625_v1  ;;  %v347_v8 = vadd.s32 %v346_v2, %v344_v63  ;;  %v419_v14 = vsub.f32 %v744_v20, %v626_v7 }
 0x1d4   : > { %v358_v6 = vpop.xlane.xlu1 %357  ;;  %v373_v11 = vpop.xlane.xlu0 %372  ;;  %vm453_vm14 = vcmp.le.f32.partialorder %v766_v44, %v633_v47 }
 0x1d5   : > { %vm396_vm5 = vcmp.eq.s32.totalorder %v332_v4, %v225_v0  ;;  %v359_v9 = vcvt.f32.s32 %v358_v6  ;;  %470 = vperm.xlu1 %660, %v418_v5   ;;  %vm397_vm6 = vcmp.eq.s32.totalorder %v347_v8, %v226_v10  ;;  %v374_v17 = vcvt.f32.s32 %v373_v11  ;;  %vm461_vm15 = vmand %vm439_vm13, %vm453_vm14 }
 0x1d6   : > { %v627_v15 = vsel %vm396_vm5, 1.0, %v687_v53  ;;  %v628_v29 = vsel %vm397_vm6, 1.0, %v687_v53  ;;  %vm437_vm5 = vcmp.gt.f32.partialorder %v758_v34, %v632_v46  ;;  %vm512_vm6 = vcmask 244736  }
 0x1d7   : > { %v362_v16 = vadd.s32 %v361_v12, %v359_v9  ;;  %v420_v27 = vsub.f32 %v752_v26, %v627_v15  ;;  %v377_v30 = vadd.s32 %v376_v23, %v374_v17  ;;  %v421_v33 = vsub.f32 %v758_v34, %v628_v29 }
 0x1d8   : > { %v388_v22 = vpop.xlane.xlu1 %387 }
 0x1d9   : > { %475 = vperm.xlu1 %660, %v419_v14   ;;  %vm398_vm7 = vcmp.eq.s32.totalorder %v362_v16, %v227_v21  ;;  %v389_v18 = vcvt.f32.s32 %v388_v22  ;;  %vm399_vm8 = vcmp.eq.s32.totalorder %v377_v30, %v228_v31 }
 0x1da   : > { %v629_v36 = vsel %vm398_vm7, 1.0, %v687_v53  ;;  %v630_v40 = vsel %vm399_vm8, 1.0, %v687_v53  ;;  %vm451_vm7 = vcmp.le.f32.partialorder %v758_v34, %v633_v47  ;;  %vm458_vm8 = vmand %vm436_vm2, %vm450_vm3  ;;  %vm535_vm3 = vcmask 237568  }
 0x1db   : > { %v392_v37 = vadd.s32 %v391_v32, %v389_v18  ;;  %v422_v39 = vsub.f32 %v760_v35, %v629_v36  ;;  %v423_v28 = vsub.f32 %v766_v44, %v630_v40  ;;  %vm459_vm11 = vmand %vm437_vm5, %vm451_vm7 }
 0x1dd   : > { %480 = vperm.xlu1 %660, %v420_v27   ;;  %vm400_vm9 = vcmp.eq.s32.totalorder %v392_v37, %v229_v38 }
 0x1de   : > { %v631_v41 = vsel %vm400_vm9, 1.0, %v687_v53  ;;  %vm438_vm9 = vcmp.gt.f32.partialorder %v760_v35, %v632_v46 }
 0x1df   : > { %v424_v42 = vsub.f32 %v768_v45, %v631_v41  ;;  %vm460_vm12 = vmand %vm438_vm9, %vm452_vm10 }
 0x1e1   : > { %485 = vperm.xlu1 %660, %v421_v33  }
 0x1e5   : > { %490 = vperm.xlu1 %660, %v422_v39  }
 0x1e9   : > { %495 = vperm.xlu1 %660, %v423_v28  }
 0x1ed   : > { %500 = vperm.xlu1 %660, %v424_v42  }
 0x250   : > { %v466_v49 = vpop.permute.xlu0 %465 }
 0x251   : > { %v503_v19 = vsel %vm818_vm1, %v466_v49, 0.0  ;;  %vm454_vm1 = vcmp.le.f32.partialorder %v768_v45, %v633_v47 }
 0x252   : > { %v513_v26 = vsel %vm512_vm6, %v503_v19, 0.0 }
 0x254   : > { %v471_v43 = vpop.permute.xlu1 %470 }
 0x255   : > { %v504_v52 = vsel %vm456_vm0, %v471_v43, 0.0  ;;  %vm440_vm0 = vcmp.gt.f32.partialorder %v768_v45, %v632_v46 }
 0x256   : > { %v514_v25 = vsel %vm512_vm6, %v504_v52, 0.0  ;;  %vm462_vm2 = vmand %vm440_vm0, %vm454_vm1 }
 0x257   : > { %v515_v56 = vadd.f32 %v514_v25, %v513_v26 }
 0x258   : > { %v476_v48 = vpop.permute.xlu1 %475 }
 0x259   : > { %v505_v20 = vsel %vm457_vm4, %v476_v48, 0.0 }
 0x25a   : > { %v516_v55 = vsel %vm512_vm6, %v505_v20, 0.0 }
 0x25b   : > { %v517_v59 = vadd.f32 %v516_v55, %v515_v56 }
 0x25c   : > { %v481_v50 = vpop.permute.xlu1 %480 }
 0x25d   : > { %v506_v54 = vsel %vm458_vm8, %v481_v50, 0.0 }
 0x25e   : > { %v518_v58 = vsel %vm512_vm6, %v506_v54, 0.0 }
 0x25f   : > { %v519_v35 = vadd.f32 %v518_v58, %v517_v59 }
 0x260   : > { %v486_v53 = vpop.permute.xlu1 %485 }
 0x261   : > { %v507_v57 = vsel %vm459_vm11, %v486_v53, 0.0 }
 0x262   : > { %v520_v61 = vsel %vm512_vm6, %v507_v57, 0.0 }
 0x263   : > { %v521_v0 = vadd.f32 %v520_v61, %v519_v35 }
 0x264   : > { %v491_v34 = vpop.permute.xlu1 %490 }
 0x265   : > { %v508_v60 = vsel %vm460_vm12, %v491_v34, 0.0 }
 0x266   : > { %v522_v62 = vsel %vm512_vm6, %v508_v60, 0.0 }
 0x267   : > { %v523_v3 = vadd.f32 %v522_v62, %v521_v0 }
 0x268   : > { %v496_v63 = vpop.permute.xlu1 %495 }
 0x269   : > { %v509_v1 = vsel %vm461_vm15, %v496_v63, 0.0 }
 0x26a   : > { %v524_v2 = vsel %vm512_vm6, %v509_v1, 0.0 }
 0x26b   : > { %v525_v5 = vadd.f32 %v524_v2, %v523_v3 }
 0x26c   : > { %v501_v4 = vpop.permute.xlu1 %500 }
 0x26d   : > { %v510_v44 = vsel %vm462_vm2, %v501_v4, 0.0 }
 0x26e   : > { %v526_v6 = vsel %vm512_vm6, %v510_v44, 0.0 }
 0x26f   : > { %v527_v7 = vadd.f32 %v526_v6, %v525_v5 }
 0x271   : > { %v528_v8 = vrot.slane %v527_v7, 4 }
 0x273   : > { %v529_v9 = vadd.f32 %v528_v8, %v527_v7 }
 0x275   : > { %v530_v10 = vrot.slane %v529_v9, 2 }
 0x277   : > { %v531_v11 = vadd.f32 %v530_v10, %v529_v9 }
 0x279   : > { %v532_v12 = vrot.slane %v531_v11, 1  ;;  %540 = sbr.rel (%p634_p5) target bundleno = 857 (0x359), region = 44 }
 0x27b   : > { %v533_v14 = vadd.f32 %v532_v12, %v531_v11 }
 0x27d   : > { %v534_v15 = vadd.f32 %v533_v14, %v511_v13 }
 0x27f   : > { %536 = vst.msk [vmem:[#allocation2] sm:$0x1] %vm535_vm3, %v534_v15 }
 0x286   : > { %v541_v45 = vld [vmem:[#allocation2] sm:$0x1] }
 0x287   : > { %v542_v16 = vand.u32 2147483647, %v541_v45 }
 0x289   : > { %v543_v17 = vsel %vm535_vm3, %v542_v16, 0.0 }
 0x28a   : > { %544 = vadd.xlane.f32.xlu0 %v543_v17 }
 0x317   : > { %v545_v21 = vpop.xlane.xlu0 %544 }
 0x318   : > { %v546_v22 = vrot.slane %v545_v21, 4 }
 0x31a   : > { %v547_v23 = vadd.f32 %v546_v22, %v545_v21 }
 0x31c   : > { %v548_v24 = vrot.slane %v547_v23, 2 }
 0x31e   : > { %v549_v27 = vadd.f32 %v548_v24, %v547_v23 }
 0x320   : > { %v550_v29 = vrot.slane %v549_v27, 1 }
 0x322   : > { %v551_v30 = vadd.f32 %v550_v29, %v549_v27 }
 0x324   : > { %639 = vpush %v551_v30 }
 0x355   : > { %s640_s29 = spop %639 }
 0x356   : > { %s555_s30 = smul.f32 0.00390625, %s640_s29 }
 0x358   : > { %557 = sst [smem:[#allocation3]] %s555_s30 }
 0x359 PF: > { %p645_p6 = scmp.eq.s32.totalorder %s720_s16, 3  ;;  %s661_s7 = scalar_lea.hbm %s863_s4, 16 }
 0x35a   : > { %p662_p7 = scmp.ne.s32.totalorder %s863_s4, %s661_s7  ;;  %p667_p10 = scmp.lt.u32.totalorder %s661_s7, %s863_s4 }
 0x35c   : > { %p663_p8 = pnand %p662_p7, %p645_p6 }
 0x35e   : > { %p664_p9 = pneg %p663_p8 }
 0x360   : > { %p669_p11 = pnand %p667_p10, %p664_p9 }
 0x362   : > { %672 = shalt.err (!%p669_p11)
}
 0x363   : > { %s688_s12 = smov [#allocation3]  }
 0x364   : > { %642 = dma.smem_to_hbm (%p645_p6), %s688_s12, 16, %s863_s4, [#allocation4]  }
 0x365   : > { %678 = dma.done.wait (%p645_p6), [#allocation4], 16  }
 0x366   : > { %680 = vsyncadd (%p645_p6), [#allocation4], 4294967280 }
 0x367   : > { %571 = sfence }
 0x368 PF: > { %s15_s15 = sadd.s32 1, %s683_s15  }
 0x369   : > { %p12_p12 = scmp.ge.s32.totalorder %s15_s15, 6  }
 0x36b   :  { %14 = sbr.rel (!%p12_p12) target bundleno = 1 (0x1), region = 75 }
 0x372   :  { %577 = vsyncpa [#allocation4], 1 }
 0x373   :  { %579 = vsyncpa [#allocation4 + $0x1], 1 }

</bundles_post_ra>
